<compile_context>
chip_gen: v6e
topology: v6e:2x2x1
jax: 0.10.0
libtpu: 0.0.40
codegen_flags: <defaults>
</compile_context>

<pallas_src>
import functools
import math

import numpy as np
import jax
import jax.numpy as jnp
from jax import lax
from jax.experimental import pallas as pl
from jax.experimental.pallas import tpu as pltpu

C_OUT = 4
KW = 3
EPS = 1e-5
_LANE = 128
_MAX_PACKED_LANES = 8192   # beyond this, pad W instead of packing rows


def cfe_kernel(x_ref, pos_ref, w1_ref, b1_ref, w2_ref, pw_ref, sh_ref, out_ref, *, width):
    # x_ref:  (1, TH, WL) f32 VMEM tile   (WL = k * width, k packed rows per lane-row)
    # pos_ref:(1, WL) i32 VMEM            -- lane position within its real-W segment
    # w1_ref: (C_OUT, KW) f32 SMEM         -- conv1 weights, BN scale folded in
    # b1_ref: (C_OUT,)    f32 SMEM         -- folded conv1 bias (= BN shift)
    # w2_ref: (C_OUT, C_OUT*KW) f32 SMEM   -- conv2 weights, BN*bn1 scales folded in
    # pw_ref: (C_OUT,)    f32 SMEM         -- 1x1 shortcut weight * bn1 scale
    # sh_ref: (C_OUT,)    f32 SMEM         -- total per-channel shift
    # out_ref:(1, C_OUT, TH, WL) f32 VMEM tile
    _, TH, WL = x_ref.shape
    x = x_ref[0]

    # Boundary masks for the zero-padded (0,1) conv; computed once per tile (hoisted).
    pos = jnp.broadcast_to(pos_ref[...], (TH, WL))
    not_first = pos != 0                 # left neighbor exists inside the W-segment
    not_last = pos != (width - 1)        # right neighbor exists inside the W-segment

    def shifts(a):
        # a[:, w-1] and a[:, w+1] with zero padding; roll by WL-1 == roll by -1 (non-neg shifts).
        left = jnp.where(not_first, pltpu.roll(a, 1, axis=1), 0.0)
        right = jnp.where(not_last, pltpu.roll(a, WL - 1, axis=1), 0.0)
        return left, a, right

    xl, xc, xr = shifts(x)

    # conv1 (1 -> 4) along W with BN folded in, then ReLU.
    a1 = []
    for co in range(C_OUT):
        h = (w1_ref[co, 0] * xl + w1_ref[co, 1] * xc + w1_ref[co, 2] * xr
             + b1_ref[co])
        a1.append(jnp.maximum(h, 0.0))

    # Shortcut + all folded shifts seed the accumulators; conv2 (4 -> 4) accumulated ci-outer
    # so each intermediate channel's l/c/r shifts are reused across the 4 output channels and
    # the live working set stays small (VPU scalar-broadcast formulation; MXU not worth it here).
    acc = [pw_ref[co] * x + sh_ref[co] for co in range(C_OUT)]
    for ci in range(C_OUT):
        l, c, r = shifts(a1[ci])
        base = ci * KW
        for co in range(C_OUT):
            acc[co] = (acc[co]
                       + w2_ref[co, base + 0] * l
                       + w2_ref[co, base + 1] * c
                       + w2_ref[co, base + 2] * r)

    for co in range(C_OUT):
        out_ref[0, co, :, :] = jnp.maximum(acc[co], 0.0)


def _tpu_vmem_capacity_bytes():
    try:
        info = pltpu.get_tpu_info()
        for attr in ("vmem_capacity_bytes", "vmem_size_bytes", "vmem_bytes"):
            v = getattr(info, attr, None)
            if v:
                return int(v)
    except Exception:
        pass
    return 64 * 1024 * 1024   # unknown -> assume v7x-like (most restrictive)


def _budget():
    """Returns (slab_elems, vmem_limit_bytes, min_grid_steps), generation-dependent."""
    cap = _tpu_vmem_capacity_bytes()
    if cap >= 96 * 1024 * 1024:
        # v5e / v6e: 128 MiB physical VMEM, single TensorCore -> big tiles, raised scoped limit.
        return 512 * 1024, 96 * 1024 * 1024, 1
    # v7x (64 MiB physical, 2 TensorCores) or unknown: keep ~12 MiB working set,
    # ensure >= 4 grid steps so both cores get sharded work via "parallel" semantics.
    return 128 * 1024, 32 * 1024 * 1024, 4


def _pick_row_tile(rows, WL, outer_steps, slab_elems, min_steps):
    # TH must be a multiple of 8 (partial last block is fine) or equal the full row dim.
    if rows <= 8:
        return rows
    cap = (slab_elems // max(WL, 1)) // 8 * 8
    cap = max(8, min(cap, rows // 8 * 8))
    th = cap
    for cand in range(cap, max(8, cap // 2) - 1, -8):   # prefer an even split when cheap
        if rows % cand == 0:
            th = cand
            break
    # Ensure enough total grid steps for multi-TensorCore sharding (v7x).
    while th > 8 and outer_steps * ((rows + th - 1) // th) < min_steps:
        th -= 8
    return th


def channel_feature_extractor(x, params):
    """x: (N, 1, H, W) float32 (NCHW). Returns (N, 4, H, W) float32."""
    N, Cin, H, W = x.shape
    assert Cin == 1
    # TODO(synk): if upstream activations are bf16, the DMA could be halved by keeping bf16
    # into the kernel and upcasting there (mainly helps v5e); f32 kept for exactness.
    x = x.astype(jnp.float32)

    # ---- Fold eval-mode BatchNorm into conv weights / biases (plain-JAX glue, runs once) ----
    bns = params["bn_gamma"] / jnp.sqrt(params["bn_var"] + EPS)
    bnh = params["bn_beta"] - params["bn_mean"] * bns
    bn1s = params["bn1_gamma"] / jnp.sqrt(params["bn1_var"] + EPS)
    bn1h = params["bn1_beta"] - params["bn1_mean"] * bn1s

    w1 = params["conv1_w"].reshape(C_OUT, KW) * bns[:, None]              # conv1 * bn scale
    b1 = bnh                                                              # bn shift as bias
    w2 = params["conv2_w"].reshape(C_OUT, C_OUT * KW) * (bns * bn1s)[:, None]
    pw = params["proj_w"].reshape(C_OUT) * bn1s
    sh = (bnh + params["proj_b"]) * bn1s + bn1h

    # ---- Lane-dense layout: WL is always a multiple of 128 ----
    k0 = _LANE // math.gcd(W, _LANE)          # k0 is a power of two; k0*W = lcm(W, 128)
    if k0 * W <= _MAX_PACKED_LANES:
        k, Wp = k0, W                         # pack k rows per lane-row, no width padding
        WL = k * W
    else:
        k, Wp = 1, -(-W // _LANE) * _LANE     # very large awkward W: pad width instead
        WL = Wp
        x = jnp.pad(x, ((0, 0), (0, 0), (0, 0), (0, Wp - W)))

    per_image = (H % k == 0) and (H // k >= 8 or N == 1)
    if per_image:
        rows = H // k
        xp = x.reshape(N, rows, WL)           # free row-major regroup of (H, W)
        n_outer = N
    else:
        # Fold batch + H into one row axis so sublanes stay occupied for small images.
        R = N * H
        R_pad = -(-R // k) * k
        xr = x.reshape(R, Wp)
        if R_pad != R:
            xr = jnp.pad(xr, ((0, R_pad - R), (0, 0)))   # extra zero rows, sliced off later
        rows = R_pad // k
        xp = xr.reshape(1, rows, WL)
        n_outer = 1

    slab_elems, vmem_limit, min_steps = _budget()
    TH = _pick_row_tile(rows, WL, n_outer, slab_elems, min_steps)
    grid = (n_outer, pl.cdiv(rows, TH))

    # lane -> position within its real-W segment (host constant; avoids in-kernel mod/div).
    pos = jnp.asarray((np.arange(WL, dtype=np.int32) % W).reshape(1, WL))

    smem = pl.BlockSpec(memory_space=pltpu.MemorySpace.SMEM)
    out = pl.pallas_call(
        functools.partial(cfe_kernel, width=W),
        out_shape=jax.ShapeDtypeStruct((n_outer, C_OUT, rows, WL), jnp.float32),
        grid=grid,
        in_specs=[pl.BlockSpec((1, TH, WL), lambda n, h: (n, h, 0)),
                  pl.BlockSpec((1, WL), lambda n, h: (0, 0)),
                  smem, smem, smem, smem, smem],
        out_specs=pl.BlockSpec((1, C_OUT, TH, WL), lambda n, h: (n, 0, h, 0)),
        compiler_params=pltpu.CompilerParams(
            dimension_semantics=("parallel", "parallel"),
            vmem_limit_bytes=vmem_limit),
    )(xp, pos, w1, b1, w2, pw, sh)

    if per_image:
        # (N, C, H/k, k*Wp) -> (N, C, H, Wp): free reshape, no transpose.
        o = out.reshape(N, C_OUT, H, Wp)
        return o[..., :W] if Wp != W else o

    # Folded-row path: (1, C, rows, k*Wp) -> (C, rows*k, Wp) (free) -> drop padding -> NCHW.
    o = out.reshape(C_OUT, rows * k, Wp)[:, :N * H, :W]
    o = o.reshape(C_OUT, N, H, W)
    return jnp.transpose(o, (1, 0, 2, 3))     # layout plumbing; kernel stays lane-dense


def ref_forward(x, params):
    """Pure-JAX reference replicating the PyTorch forward (eval mode)."""
    def bn(h, g, b, m, v):
        s = g / jnp.sqrt(v + EPS)
        return h * s[None, :, None, None] + (b - m * s)[None, :, None, None]

    def conv13(h, w):  # kernel (1,3), padding (0,1), stride 1, no bias
        return lax.conv_general_dilated(
            h, w, window_strides=(1, 1), padding=((0, 0), (1, 1)),
            dimension_numbers=("NCHW", "OIHW", "NCHW"))

    identity = x
    h = conv13(x, params["conv1_w"])
    h = jax.nn.relu(bn(h, params["bn_gamma"], params["bn_beta"],
                       params["bn_mean"], params["bn_var"]))
    h = conv13(h, params["conv2_w"])
    h = bn(h, params["bn_gamma"], params["bn_beta"],
           params["bn_mean"], params["bn_var"])
    ident = lax.conv_general_dilated(
        identity, params["proj_w"], (1, 1), "VALID",
        dimension_numbers=("NCHW", "OIHW", "NCHW")) + params["proj_b"][None, :, None, None]
    h = h + ident
    h = jax.nn.relu(bn(h, params["bn1_gamma"], params["bn1_beta"],
                       params["bn1_mean"], params["bn1_var"]))
    return h


def make_params(key):
    ks = jax.random.split(key, 12)
    return {
        "conv1_w": jax.random.normal(ks[0], (C_OUT, 1, 1, KW), jnp.float32) * 0.5,
        "conv2_w": jax.random.normal(ks[1], (C_OUT, C_OUT, 1, KW), jnp.float32) * 0.3,
        "proj_w": jax.random.normal(ks[2], (C_OUT, 1, 1, 1), jnp.float32) * 0.5,
        "proj_b": jax.random.normal(ks[3], (C_OUT,), jnp.float32) * 0.1,
        "bn_gamma": 1.0 + 0.1 * jax.random.normal(ks[4], (C_OUT,), jnp.float32),
        "bn_beta": 0.1 * jax.random.normal(ks[5], (C_OUT,), jnp.float32),
        "bn_mean": 0.1 * jax.random.normal(ks[6], (C_OUT,), jnp.float32),
        "bn_var": jax.random.uniform(ks[7], (C_OUT,), jnp.float32, 0.5, 1.5),
        "bn1_gamma": 1.0 + 0.1 * jax.random.normal(ks[8], (C_OUT,), jnp.float32),
        "bn1_beta": 0.1 * jax.random.normal(ks[9], (C_OUT,), jnp.float32),
        "bn1_mean": 0.1 * jax.random.normal(ks[10], (C_OUT,), jnp.float32),
        "bn1_var": jax.random.uniform(ks[11], (C_OUT,), jnp.float32, 0.5, 1.5),
    }


if __name__ == "__main__":
    key = jax.random.PRNGKey(0)
    kx1, kx2, kp = jax.random.split(key, 3)
    params = make_params(kp)

    # Small image (2,1,16,16): exercises the folded-row path (batch rows packed into lanes).
    x1 = jax.random.normal(kx1, (2, 1, 16, 16), jnp.float32)
    out1 = jax.block_until_ready(channel_feature_extractor(x1, params))
    ref1 = jax.block_until_ready(ref_forward(x1, params))
    assert out1.shape == (2, C_OUT, 16, 16), out1.shape
    err1 = float(jnp.max(jnp.abs(out1 - ref1)))
    assert jnp.allclose(out1, ref1, atol=1e-4, rtol=1e-4), err1

    # Taller image (2,1,32,64): exercises the per-image packed path (k=2, no transpose).
    x2 = jax.random.normal(kx2, (2, 1, 32, 64), jnp.float32)
    out2 = jax.block_until_ready(channel_feature_extractor(x2, params))
    ref2 = jax.block_until_ready(ref_forward(x2, params))
    assert out2.shape == (2, C_OUT, 32, 64), out2.shape
    err2 = float(jnp.max(jnp.abs(out2 - ref2)))
    assert jnp.allclose(out2, ref2, atol=1e-4, rtol=1e-4), err2

    print("KERNEL_OK")
</pallas_src>

<mosaic_0001>
module attributes {stable_mosaic.version = 11 : i64} {
  func.func @cfe_kernel(%arg0: i32, %arg1: i32, %arg2: memref<1x4x128xf32, #tpu.memory_space<vmem>>, %arg3: memref<1x128xi32, #tpu.memory_space<vmem>>, %arg4: memref<4x3xf32, #tpu.memory_space<smem>>, %arg5: memref<4xf32, #tpu.memory_space<smem>>, %arg6: memref<4x12xf32, #tpu.memory_space<smem>>, %arg7: memref<4xf32, #tpu.memory_space<smem>>, %arg8: memref<4xf32, #tpu.memory_space<smem>>, %arg9: memref<1x4x4x128xf32, #tpu.memory_space<vmem>>) attributes {dimension_semantics = [#tpu.dimension_semantics<parallel>, #tpu.dimension_semantics<parallel>], iteration_bounds = array<i64: 1, 1>, scalar_prefetch = 0 : i64, scratch_operands = 0 : i64, tpu.core_type = #tpu.core_type<tc>, window_params = [{transform_indices = @transform_0, window_bounds = array<i64: 1, 4, 128>}, {pipeline_mode = #tpu.pipeline_mode<synchronous>, transform_indices = @transform_1, window_bounds = array<i64: 1, 128>}, {transform_indices = @transform_2, window_bounds = array<i64: 4, 3>}, {transform_indices = @transform_3, window_bounds = array<i64: 4>}, {transform_indices = @transform_4, window_bounds = array<i64: 4, 12>}, {transform_indices = @transform_5, window_bounds = array<i64: 4>}, {transform_indices = @transform_6, window_bounds = array<i64: 4>}, {transform_indices = @transform_7, window_bounds = array<i64: 1, 4, 4, 128>}]} {
    %c0 = arith.constant 0 : index
    %c0_0 = arith.constant 0 : index
    %c0_1 = arith.constant 0 : index
    %0 = vector.load %arg2[%c0, %c0_0, %c0_1] : memref<1x4x128xf32, #tpu.memory_space<vmem>>, vector<1x4x128xf32>
    %1 = vector.shape_cast %0 : vector<1x4x128xf32> to vector<4x128xf32>
    %c0_2 = arith.constant 0 : index
    %c0_3 = arith.constant 0 : index
    %2 = vector.load %arg3[%c0_2, %c0_3] : memref<1x128xi32, #tpu.memory_space<vmem>>, vector<1x128xi32>
    %3 = vector.shape_cast %2 : vector<1x128xi32> to vector<1x128xi32>
    %4 = vector.broadcast %3 : vector<1x128xi32> to vector<4x128xi32>
    %c0_i32 = arith.constant 0 : i32
    %5 = vector.broadcast %c0_i32 : i32 to vector<4x128xi32>
    %6 = arith.cmpi ne, %4, %5 : vector<4x128xi32>
    %c15_i32 = arith.constant 15 : i32
    %7 = vector.broadcast %c15_i32 : i32 to vector<4x128xi32>
    %8 = arith.cmpi ne, %4, %7 : vector<4x128xi32>
    %c1_i32 = arith.constant 1 : i32
    %9 = tpu.dynamic_rotate %1 by %c1_i32 dim 1 : vector<4x128xf32>, i32 -> vector<4x128xf32>
    %cst = arith.constant 0.000000e+00 : f32
    %10 = vector.broadcast %cst : f32 to vector<4x128xf32>
    %11 = arith.select %6, %9, %10 : vector<4x128xi1>, vector<4x128xf32>
    %c127_i32 = arith.constant 127 : i32
    %12 = tpu.dynamic_rotate %1 by %c127_i32 dim 1 : vector<4x128xf32>, i32 -> vector<4x128xf32>
    %cst_4 = arith.constant 0.000000e+00 : f32
    %13 = vector.broadcast %cst_4 : f32 to vector<4x128xf32>
    %14 = arith.select %8, %12, %13 : vector<4x128xi1>, vector<4x128xf32>
    %c0_5 = arith.constant 0 : index
    %c0_6 = arith.constant 0 : index
    %15 = memref.load %arg4[%c0_5, %c0_6] : memref<4x3xf32, #tpu.memory_space<smem>>
    %16 = vector.broadcast %15 : f32 to vector<4x128xf32>
    %17 = arith.mulf %16, %11 : vector<4x128xf32>
    %c0_7 = arith.constant 0 : index
    %c1 = arith.constant 1 : index
    %18 = memref.load %arg4[%c0_7, %c1] : memref<4x3xf32, #tpu.memory_space<smem>>
    %19 = vector.broadcast %18 : f32 to vector<4x128xf32>
    %20 = arith.mulf %19, %1 : vector<4x128xf32>
    %21 = arith.addf %17, %20 : vector<4x128xf32>
    %c0_8 = arith.constant 0 : index
    %c2 = arith.constant 2 : index
    %22 = memref.load %arg4[%c0_8, %c2] : memref<4x3xf32, #tpu.memory_space<smem>>
    %23 = vector.broadcast %22 : f32 to vector<4x128xf32>
    %24 = arith.mulf %23, %14 : vector<4x128xf32>
    %25 = arith.addf %21, %24 : vector<4x128xf32>
    %c0_9 = arith.constant 0 : index
    %26 = memref.load %arg5[%c0_9] : memref<4xf32, #tpu.memory_space<smem>>
    %27 = vector.broadcast %26 : f32 to vector<4x128xf32>
    %28 = arith.addf %25, %27 : vector<4x128xf32>
    %cst_10 = arith.constant 0.000000e+00 : f32
    %29 = vector.broadcast %cst_10 : f32 to vector<4x128xf32>
    %30 = arith.maximumf %28, %29 : vector<4x128xf32>
    %c1_11 = arith.constant 1 : index
    %c0_12 = arith.constant 0 : index
    %31 = memref.load %arg4[%c1_11, %c0_12] : memref<4x3xf32, #tpu.memory_space<smem>>
    %32 = vector.broadcast %31 : f32 to vector<4x128xf32>
    %33 = arith.mulf %32, %11 : vector<4x128xf32>
    %c1_13 = arith.constant 1 : index
    %c1_14 = arith.constant 1 : index
    %34 = memref.load %arg4[%c1_13, %c1_14] : memref<4x3xf32, #tpu.memory_space<smem>>
    %35 = vector.broadcast %34 : f32 to vector<4x128xf32>
    %36 = arith.mulf %35, %1 : vector<4x128xf32>
    %37 = arith.addf %33, %36 : vector<4x128xf32>
    %c1_15 = arith.constant 1 : index
    %c2_16 = arith.constant 2 : index
    %38 = memref.load %arg4[%c1_15, %c2_16] : memref<4x3xf32, #tpu.memory_space<smem>>
    %39 = vector.broadcast %38 : f32 to vector<4x128xf32>
    %40 = arith.mulf %39, %14 : vector<4x128xf32>
    %41 = arith.addf %37, %40 : vector<4x128xf32>
    %c1_17 = arith.constant 1 : index
    %42 = memref.load %arg5[%c1_17] : memref<4xf32, #tpu.memory_space<smem>>
    %43 = vector.broadcast %42 : f32 to vector<4x128xf32>
    %44 = arith.addf %41, %43 : vector<4x128xf32>
    %cst_18 = arith.constant 0.000000e+00 : f32
    %45 = vector.broadcast %cst_18 : f32 to vector<4x128xf32>
    %46 = arith.maximumf %44, %45 : vector<4x128xf32>
    %c2_19 = arith.constant 2 : index
    %c0_20 = arith.constant 0 : index
    %47 = memref.load %arg4[%c2_19, %c0_20] : memref<4x3xf32, #tpu.memory_space<smem>>
    %48 = vector.broadcast %47 : f32 to vector<4x128xf32>
    %49 = arith.mulf %48, %11 : vector<4x128xf32>
    %c2_21 = arith.constant 2 : index
    %c1_22 = arith.constant 1 : index
    %50 = memref.load %arg4[%c2_21, %c1_22] : memref<4x3xf32, #tpu.memory_space<smem>>
    %51 = vector.broadcast %50 : f32 to vector<4x128xf32>
    %52 = arith.mulf %51, %1 : vector<4x128xf32>
    %53 = arith.addf %49, %52 : vector<4x128xf32>
    %c2_23 = arith.constant 2 : index
    %c2_24 = arith.constant 2 : index
    %54 = memref.load %arg4[%c2_23, %c2_24] : memref<4x3xf32, #tpu.memory_space<smem>>
    %55 = vector.broadcast %54 : f32 to vector<4x128xf32>
    %56 = arith.mulf %55, %14 : vector<4x128xf32>
    %57 = arith.addf %53, %56 : vector<4x128xf32>
    %c2_25 = arith.constant 2 : index
    %58 = memref.load %arg5[%c2_25] : memref<4xf32, #tpu.memory_space<smem>>
    %59 = vector.broadcast %58 : f32 to vector<4x128xf32>
    %60 = arith.addf %57, %59 : vector<4x128xf32>
    %cst_26 = arith.constant 0.000000e+00 : f32
    %61 = vector.broadcast %cst_26 : f32 to vector<4x128xf32>
    %62 = arith.maximumf %60, %61 : vector<4x128xf32>
    %c3 = arith.constant 3 : index
    %c0_27 = arith.constant 0 : index
    %63 = memref.load %arg4[%c3, %c0_27] : memref<4x3xf32, #tpu.memory_space<smem>>
    %64 = vector.broadcast %63 : f32 to vector<4x128xf32>
    %65 = arith.mulf %64, %11 : vector<4x128xf32>
    %c3_28 = arith.constant 3 : index
    %c1_29 = arith.constant 1 : index
    %66 = memref.load %arg4[%c3_28, %c1_29] : memref<4x3xf32, #tpu.memory_space<smem>>
    %67 = vector.broadcast %66 : f32 to vector<4x128xf32>
    %68 = arith.mulf %67, %1 : vector<4x128xf32>
    %69 = arith.addf %65, %68 : vector<4x128xf32>
    %c3_30 = arith.constant 3 : index
    %c2_31 = arith.constant 2 : index
    %70 = memref.load %arg4[%c3_30, %c2_31] : memref<4x3xf32, #tpu.memory_space<smem>>
    %71 = vector.broadcast %70 : f32 to vector<4x128xf32>
    %72 = arith.mulf %71, %14 : vector<4x128xf32>
    %73 = arith.addf %69, %72 : vector<4x128xf32>
    %c3_32 = arith.constant 3 : index
    %74 = memref.load %arg5[%c3_32] : memref<4xf32, #tpu.memory_space<smem>>
    %75 = vector.broadcast %74 : f32 to vector<4x128xf32>
    %76 = arith.addf %73, %75 : vector<4x128xf32>
    %cst_33 = arith.constant 0.000000e+00 : f32
    %77 = vector.broadcast %cst_33 : f32 to vector<4x128xf32>
    %78 = arith.maximumf %76, %77 : vector<4x128xf32>
    %c0_34 = arith.constant 0 : index
    %79 = memref.load %arg7[%c0_34] : memref<4xf32, #tpu.memory_space<smem>>
    %80 = vector.broadcast %79 : f32 to vector<4x128xf32>
    %81 = arith.mulf %80, %1 : vector<4x128xf32>
    %c0_35 = arith.constant 0 : index
    %82 = memref.load %arg8[%c0_35] : memref<4xf32, #tpu.memory_space<smem>>
    %83 = vector.broadcast %82 : f32 to vector<4x128xf32>
    %84 = arith.addf %81, %83 : vector<4x128xf32>
    %c1_36 = arith.constant 1 : index
    %85 = memref.load %arg7[%c1_36] : memref<4xf32, #tpu.memory_space<smem>>
    %86 = vector.broadcast %85 : f32 to vector<4x128xf32>
    %87 = arith.mulf %86, %1 : vector<4x128xf32>
    %c1_37 = arith.constant 1 : index
    %88 = memref.load %arg8[%c1_37] : memref<4xf32, #tpu.memory_space<smem>>
    %89 = vector.broadcast %88 : f32 to vector<4x128xf32>
    %90 = arith.addf %87, %89 : vector<4x128xf32>
    %c2_38 = arith.constant 2 : index
    %91 = memref.load %arg7[%c2_38] : memref<4xf32, #tpu.memory_space<smem>>
    %92 = vector.broadcast %91 : f32 to vector<4x128xf32>
    %93 = arith.mulf %92, %1 : vector<4x128xf32>
    %c2_39 = arith.constant 2 : index
    %94 = memref.load %arg8[%c2_39] : memref<4xf32, #tpu.memory_space<smem>>
    %95 = vector.broadcast %94 : f32 to vector<4x128xf32>
    %96 = arith.addf %93, %95 : vector<4x128xf32>
    %c3_40 = arith.constant 3 : index
    %97 = memref.load %arg7[%c3_40] : memref<4xf32, #tpu.memory_space<smem>>
    %98 = vector.broadcast %97 : f32 to vector<4x128xf32>
    %99 = arith.mulf %98, %1 : vector<4x128xf32>
    %c3_41 = arith.constant 3 : index
    %100 = memref.load %arg8[%c3_41] : memref<4xf32, #tpu.memory_space<smem>>
    %101 = vector.broadcast %100 : f32 to vector<4x128xf32>
    %102 = arith.addf %99, %101 : vector<4x128xf32>
    %c1_i32_42 = arith.constant 1 : i32
    %103 = tpu.dynamic_rotate %30 by %c1_i32_42 dim 1 : vector<4x128xf32>, i32 -> vector<4x128xf32>
    %cst_43 = arith.constant 0.000000e+00 : f32
    %104 = vector.broadcast %cst_43 : f32 to vector<4x128xf32>
    %105 = arith.select %6, %103, %104 : vector<4x128xi1>, vector<4x128xf32>
    %c127_i32_44 = arith.constant 127 : i32
    %106 = tpu.dynamic_rotate %30 by %c127_i32_44 dim 1 : vector<4x128xf32>, i32 -> vector<4x128xf32>
    %cst_45 = arith.constant 0.000000e+00 : f32
    %107 = vector.broadcast %cst_45 : f32 to vector<4x128xf32>
    %108 = arith.select %8, %106, %107 : vector<4x128xi1>, vector<4x128xf32>
    %c0_46 = arith.constant 0 : index
    %c0_47 = arith.constant 0 : index
    %109 = memref.load %arg6[%c0_46, %c0_47] : memref<4x12xf32, #tpu.memory_space<smem>>
    %110 = vector.broadcast %109 : f32 to vector<4x128xf32>
    %111 = arith.mulf %110, %105 : vector<4x128xf32>
    %112 = arith.addf %84, %111 : vector<4x128xf32>
    %c0_48 = arith.constant 0 : index
    %c1_49 = arith.constant 1 : index
    %113 = memref.load %arg6[%c0_48, %c1_49] : memref<4x12xf32, #tpu.memory_space<smem>>
    %114 = vector.broadcast %113 : f32 to vector<4x128xf32>
    %115 = arith.mulf %114, %30 : vector<4x128xf32>
    %116 = arith.addf %112, %115 : vector<4x128xf32>
    %c0_50 = arith.constant 0 : index
    %c2_51 = arith.constant 2 : index
    %117 = memref.load %arg6[%c0_50, %c2_51] : memref<4x12xf32, #tpu.memory_space<smem>>
    %118 = vector.broadcast %117 : f32 to vector<4x128xf32>
    %119 = arith.mulf %118, %108 : vector<4x128xf32>
    %120 = arith.addf %116, %119 : vector<4x128xf32>
    %c1_52 = arith.constant 1 : index
    %c0_53 = arith.constant 0 : index
    %121 = memref.load %arg6[%c1_52, %c0_53] : memref<4x12xf32, #tpu.memory_space<smem>>
    %122 = vector.broadcast %121 : f32 to vector<4x128xf32>
    %123 = arith.mulf %122, %105 : vector<4x128xf32>
    %124 = arith.addf %90, %123 : vector<4x128xf32>
    %c1_54 = arith.constant 1 : index
    %c1_55 = arith.constant 1 : index
    %125 = memref.load %arg6[%c1_54, %c1_55] : memref<4x12xf32, #tpu.memory_space<smem>>
    %126 = vector.broadcast %125 : f32 to vector<4x128xf32>
    %127 = arith.mulf %126, %30 : vector<4x128xf32>
    %128 = arith.addf %124, %127 : vector<4x128xf32>
    %c1_56 = arith.constant 1 : index
    %c2_57 = arith.constant 2 : index
    %129 = memref.load %arg6[%c1_56, %c2_57] : memref<4x12xf32, #tpu.memory_space<smem>>
    %130 = vector.broadcast %129 : f32 to vector<4x128xf32>
    %131 = arith.mulf %130, %108 : vector<4x128xf32>
    %132 = arith.addf %128, %131 : vector<4x128xf32>
    %c2_58 = arith.constant 2 : index
    %c0_59 = arith.constant 0 : index
    %133 = memref.load %arg6[%c2_58, %c0_59] : memref<4x12xf32, #tpu.memory_space<smem>>
    %134 = vector.broadcast %133 : f32 to vector<4x128xf32>
    %135 = arith.mulf %134, %105 : vector<4x128xf32>
    %136 = arith.addf %96, %135 : vector<4x128xf32>
    %c2_60 = arith.constant 2 : index
    %c1_61 = arith.constant 1 : index
    %137 = memref.load %arg6[%c2_60, %c1_61] : memref<4x12xf32, #tpu.memory_space<smem>>
    %138 = vector.broadcast %137 : f32 to vector<4x128xf32>
    %139 = arith.mulf %138, %30 : vector<4x128xf32>
    %140 = arith.addf %136, %139 : vector<4x128xf32>
    %c2_62 = arith.constant 2 : index
    %c2_63 = arith.constant 2 : index
    %141 = memref.load %arg6[%c2_62, %c2_63] : memref<4x12xf32, #tpu.memory_space<smem>>
    %142 = vector.broadcast %141 : f32 to vector<4x128xf32>
    %143 = arith.mulf %142, %108 : vector<4x128xf32>
    %144 = arith.addf %140, %143 : vector<4x128xf32>
    %c3_64 = arith.constant 3 : index
    %c0_65 = arith.constant 0 : index
    %145 = memref.load %arg6[%c3_64, %c0_65] : memref<4x12xf32, #tpu.memory_space<smem>>
    %146 = vector.broadcast %145 : f32 to vector<4x128xf32>
    %147 = arith.mulf %146, %105 : vector<4x128xf32>
    %148 = arith.addf %102, %147 : vector<4x128xf32>
    %c3_66 = arith.constant 3 : index
    %c1_67 = arith.constant 1 : index
    %149 = memref.load %arg6[%c3_66, %c1_67] : memref<4x12xf32, #tpu.memory_space<smem>>
    %150 = vector.broadcast %149 : f32 to vector<4x128xf32>
    %151 = arith.mulf %150, %30 : vector<4x128xf32>
    %152 = arith.addf %148, %151 : vector<4x128xf32>
    %c3_68 = arith.constant 3 : index
    %c2_69 = arith.constant 2 : index
    %153 = memref.load %arg6[%c3_68, %c2_69] : memref<4x12xf32, #tpu.memory_space<smem>>
    %154 = vector.broadcast %153 : f32 to vector<4x128xf32>
    %155 = arith.mulf %154, %108 : vector<4x128xf32>
    %156 = arith.addf %152, %155 : vector<4x128xf32>
    %c1_i32_70 = arith.constant 1 : i32
    %157 = tpu.dynamic_rotate %46 by %c1_i32_70 dim 1 : vector<4x128xf32>, i32 -> vector<4x128xf32>
    %cst_71 = arith.constant 0.000000e+00 : f32
    %158 = vector.broadcast %cst_71 : f32 to vector<4x128xf32>
    %159 = arith.select %6, %157, %158 : vector<4x128xi1>, vector<4x128xf32>
    %c127_i32_72 = arith.constant 127 : i32
    %160 = tpu.dynamic_rotate %46 by %c127_i32_72 dim 1 : vector<4x128xf32>, i32 -> vector<4x128xf32>
    %cst_73 = arith.constant 0.000000e+00 : f32
    %161 = vector.broadcast %cst_73 : f32 to vector<4x128xf32>
    %162 = arith.select %8, %160, %161 : vector<4x128xi1>, vector<4x128xf32>
    %c0_74 = arith.constant 0 : index
    %c3_75 = arith.constant 3 : index
    %163 = memref.load %arg6[%c0_74, %c3_75] : memref<4x12xf32, #tpu.memory_space<smem>>
    %164 = vector.broadcast %163 : f32 to vector<4x128xf32>
    %165 = arith.mulf %164, %159 : vector<4x128xf32>
    %166 = arith.addf %120, %165 : vector<4x128xf32>
    %c0_76 = arith.constant 0 : index
    %c4 = arith.constant 4 : index
    %167 = memref.load %arg6[%c0_76, %c4] : memref<4x12xf32, #tpu.memory_space<smem>>
    %168 = vector.broadcast %167 : f32 to vector<4x128xf32>
    %169 = arith.mulf %168, %46 : vector<4x128xf32>
    %170 = arith.addf %166, %169 : vector<4x128xf32>
    %c0_77 = arith.constant 0 : index
    %c5 = arith.constant 5 : index
    %171 = memref.load %arg6[%c0_77, %c5] : memref<4x12xf32, #tpu.memory_space<smem>>
    %172 = vector.broadcast %171 : f32 to vector<4x128xf32>
    %173 = arith.mulf %172, %162 : vector<4x128xf32>
    %174 = arith.addf %170, %173 : vector<4x128xf32>
    %c1_78 = arith.constant 1 : index
    %c3_79 = arith.constant 3 : index
    %175 = memref.load %arg6[%c1_78, %c3_79] : memref<4x12xf32, #tpu.memory_space<smem>>
    %176 = vector.broadcast %175 : f32 to vector<4x128xf32>
    %177 = arith.mulf %176, %159 : vector<4x128xf32>
    %178 = arith.addf %132, %177 : vector<4x128xf32>
    %c1_80 = arith.constant 1 : index
    %c4_81 = arith.constant 4 : index
    %179 = memref.load %arg6[%c1_80, %c4_81] : memref<4x12xf32, #tpu.memory_space<smem>>
    %180 = vector.broadcast %179 : f32 to vector<4x128xf32>
    %181 = arith.mulf %180, %46 : vector<4x128xf32>
    %182 = arith.addf %178, %181 : vector<4x128xf32>
    %c1_82 = arith.constant 1 : index
    %c5_83 = arith.constant 5 : index
    %183 = memref.load %arg6[%c1_82, %c5_83] : memref<4x12xf32, #tpu.memory_space<smem>>
    %184 = vector.broadcast %183 : f32 to vector<4x128xf32>
    %185 = arith.mulf %184, %162 : vector<4x128xf32>
    %186 = arith.addf %182, %185 : vector<4x128xf32>
    %c2_84 = arith.constant 2 : index
    %c3_85 = arith.constant 3 : index
    %187 = memref.load %arg6[%c2_84, %c3_85] : memref<4x12xf32, #tpu.memory_space<smem>>
    %188 = vector.broadcast %187 : f32 to vector<4x128xf32>
    %189 = arith.mulf %188, %159 : vector<4x128xf32>
    %190 = arith.addf %144, %189 : vector<4x128xf32>
    %c2_86 = arith.constant 2 : index
    %c4_87 = arith.constant 4 : index
    %191 = memref.load %arg6[%c2_86, %c4_87] : memref<4x12xf32, #tpu.memory_space<smem>>
    %192 = vector.broadcast %191 : f32 to vector<4x128xf32>
    %193 = arith.mulf %192, %46 : vector<4x128xf32>
    %194 = arith.addf %190, %193 : vector<4x128xf32>
    %c2_88 = arith.constant 2 : index
    %c5_89 = arith.constant 5 : index
    %195 = memref.load %arg6[%c2_88, %c5_89] : memref<4x12xf32, #tpu.memory_space<smem>>
    %196 = vector.broadcast %195 : f32 to vector<4x128xf32>
    %197 = arith.mulf %196, %162 : vector<4x128xf32>
    %198 = arith.addf %194, %197 : vector<4x128xf32>
    %c3_90 = arith.constant 3 : index
    %c3_91 = arith.constant 3 : index
    %199 = memref.load %arg6[%c3_90, %c3_91] : memref<4x12xf32, #tpu.memory_space<smem>>
    %200 = vector.broadcast %199 : f32 to vector<4x128xf32>
    %201 = arith.mulf %200, %159 : vector<4x128xf32>
    %202 = arith.addf %156, %201 : vector<4x128xf32>
    %c3_92 = arith.constant 3 : index
    %c4_93 = arith.constant 4 : index
    %203 = memref.load %arg6[%c3_92, %c4_93] : memref<4x12xf32, #tpu.memory_space<smem>>
    %204 = vector.broadcast %203 : f32 to vector<4x128xf32>
    %205 = arith.mulf %204, %46 : vector<4x128xf32>
    %206 = arith.addf %202, %205 : vector<4x128xf32>
    %c3_94 = arith.constant 3 : index
    %c5_95 = arith.constant 5 : index
    %207 = memref.load %arg6[%c3_94, %c5_95] : memref<4x12xf32, #tpu.memory_space<smem>>
    %208 = vector.broadcast %207 : f32 to vector<4x128xf32>
    %209 = arith.mulf %208, %162 : vector<4x128xf32>
    %210 = arith.addf %206, %209 : vector<4x128xf32>
    %c1_i32_96 = arith.constant 1 : i32
    %211 = tpu.dynamic_rotate %62 by %c1_i32_96 dim 1 : vector<4x128xf32>, i32 -> vector<4x128xf32>
    %cst_97 = arith.constant 0.000000e+00 : f32
    %212 = vector.broadcast %cst_97 : f32 to vector<4x128xf32>
    %213 = arith.select %6, %211, %212 : vector<4x128xi1>, vector<4x128xf32>
    %c127_i32_98 = arith.constant 127 : i32
    %214 = tpu.dynamic_rotate %62 by %c127_i32_98 dim 1 : vector<4x128xf32>, i32 -> vector<4x128xf32>
    %cst_99 = arith.constant 0.000000e+00 : f32
    %215 = vector.broadcast %cst_99 : f32 to vector<4x128xf32>
    %216 = arith.select %8, %214, %215 : vector<4x128xi1>, vector<4x128xf32>
    %c0_100 = arith.constant 0 : index
    %c6 = arith.constant 6 : index
    %217 = memref.load %arg6[%c0_100, %c6] : memref<4x12xf32, #tpu.memory_space<smem>>
    %218 = vector.broadcast %217 : f32 to vector<4x128xf32>
    %219 = arith.mulf %218, %213 : vector<4x128xf32>
    %220 = arith.addf %174, %219 : vector<4x128xf32>
    %c0_101 = arith.constant 0 : index
    %c7 = arith.constant 7 : index
    %221 = memref.load %arg6[%c0_101, %c7] : memref<4x12xf32, #tpu.memory_space<smem>>
    %222 = vector.broadcast %221 : f32 to vector<4x128xf32>
    %223 = arith.mulf %222, %62 : vector<4x128xf32>
    %224 = arith.addf %220, %223 : vector<4x128xf32>
    %c0_102 = arith.constant 0 : index
    %c8 = arith.constant 8 : index
    %225 = memref.load %arg6[%c0_102, %c8] : memref<4x12xf32, #tpu.memory_space<smem>>
    %226 = vector.broadcast %225 : f32 to vector<4x128xf32>
    %227 = arith.mulf %226, %216 : vector<4x128xf32>
    %228 = arith.addf %224, %227 : vector<4x128xf32>
    %c1_103 = arith.constant 1 : index
    %c6_104 = arith.constant 6 : index
    %229 = memref.load %arg6[%c1_103, %c6_104] : memref<4x12xf32, #tpu.memory_space<smem>>
    %230 = vector.broadcast %229 : f32 to vector<4x128xf32>
    %231 = arith.mulf %230, %213 : vector<4x128xf32>
    %232 = arith.addf %186, %231 : vector<4x128xf32>
    %c1_105 = arith.constant 1 : index
    %c7_106 = arith.constant 7 : index
    %233 = memref.load %arg6[%c1_105, %c7_106] : memref<4x12xf32, #tpu.memory_space<smem>>
    %234 = vector.broadcast %233 : f32 to vector<4x128xf32>
    %235 = arith.mulf %234, %62 : vector<4x128xf32>
    %236 = arith.addf %232, %235 : vector<4x128xf32>
    %c1_107 = arith.constant 1 : index
    %c8_108 = arith.constant 8 : index
    %237 = memref.load %arg6[%c1_107, %c8_108] : memref<4x12xf32, #tpu.memory_space<smem>>
    %238 = vector.broadcast %237 : f32 to vector<4x128xf32>
    %239 = arith.mulf %238, %216 : vector<4x128xf32>
    %240 = arith.addf %236, %239 : vector<4x128xf32>
    %c2_109 = arith.constant 2 : index
    %c6_110 = arith.constant 6 : index
    %241 = memref.load %arg6[%c2_109, %c6_110] : memref<4x12xf32, #tpu.memory_space<smem>>
    %242 = vector.broadcast %241 : f32 to vector<4x128xf32>
    %243 = arith.mulf %242, %213 : vector<4x128xf32>
    %244 = arith.addf %198, %243 : vector<4x128xf32>
    %c2_111 = arith.constant 2 : index
    %c7_112 = arith.constant 7 : index
    %245 = memref.load %arg6[%c2_111, %c7_112] : memref<4x12xf32, #tpu.memory_space<smem>>
    %246 = vector.broadcast %245 : f32 to vector<4x128xf32>
    %247 = arith.mulf %246, %62 : vector<4x128xf32>
    %248 = arith.addf %244, %247 : vector<4x128xf32>
    %c2_113 = arith.constant 2 : index
    %c8_114 = arith.constant 8 : index
    %249 = memref.load %arg6[%c2_113, %c8_114] : memref<4x12xf32, #tpu.memory_space<smem>>
    %250 = vector.broadcast %249 : f32 to vector<4x128xf32>
    %251 = arith.mulf %250, %216 : vector<4x128xf32>
    %252 = arith.addf %248, %251 : vector<4x128xf32>
    %c3_115 = arith.constant 3 : index
    %c6_116 = arith.constant 6 : index
    %253 = memref.load %arg6[%c3_115, %c6_116] : memref<4x12xf32, #tpu.memory_space<smem>>
    %254 = vector.broadcast %253 : f32 to vector<4x128xf32>
    %255 = arith.mulf %254, %213 : vector<4x128xf32>
    %256 = arith.addf %210, %255 : vector<4x128xf32>
    %c3_117 = arith.constant 3 : index
    %c7_118 = arith.constant 7 : index
    %257 = memref.load %arg6[%c3_117, %c7_118] : memref<4x12xf32, #tpu.memory_space<smem>>
    %258 = vector.broadcast %257 : f32 to vector<4x128xf32>
    %259 = arith.mulf %258, %62 : vector<4x128xf32>
    %260 = arith.addf %256, %259 : vector<4x128xf32>
    %c3_119 = arith.constant 3 : index
    %c8_120 = arith.constant 8 : index
    %261 = memref.load %arg6[%c3_119, %c8_120] : memref<4x12xf32, #tpu.memory_space<smem>>
    %262 = vector.broadcast %261 : f32 to vector<4x128xf32>
    %263 = arith.mulf %262, %216 : vector<4x128xf32>
    %264 = arith.addf %260, %263 : vector<4x128xf32>
    %c1_i32_121 = arith.constant 1 : i32
    %265 = tpu.dynamic_rotate %78 by %c1_i32_121 dim 1 : vector<4x128xf32>, i32 -> vector<4x128xf32>
    %cst_122 = arith.constant 0.000000e+00 : f32
    %266 = vector.broadcast %cst_122 : f32 to vector<4x128xf32>
    %267 = arith.select %6, %265, %266 : vector<4x128xi1>, vector<4x128xf32>
    %c127_i32_123 = arith.constant 127 : i32
    %268 = tpu.dynamic_rotate %78 by %c127_i32_123 dim 1 : vector<4x128xf32>, i32 -> vector<4x128xf32>
    %cst_124 = arith.constant 0.000000e+00 : f32
    %269 = vector.broadcast %cst_124 : f32 to vector<4x128xf32>
    %270 = arith.select %8, %268, %269 : vector<4x128xi1>, vector<4x128xf32>
    %c0_125 = arith.constant 0 : index
    %c9 = arith.constant 9 : index
    %271 = memref.load %arg6[%c0_125, %c9] : memref<4x12xf32, #tpu.memory_space<smem>>
    %272 = vector.broadcast %271 : f32 to vector<4x128xf32>
    %273 = arith.mulf %272, %267 : vector<4x128xf32>
    %274 = arith.addf %228, %273 : vector<4x128xf32>
    %c0_126 = arith.constant 0 : index
    %c10 = arith.constant 10 : index
    %275 = memref.load %arg6[%c0_126, %c10] : memref<4x12xf32, #tpu.memory_space<smem>>
    %276 = vector.broadcast %275 : f32 to vector<4x128xf32>
    %277 = arith.mulf %276, %78 : vector<4x128xf32>
    %278 = arith.addf %274, %277 : vector<4x128xf32>
    %c0_127 = arith.constant 0 : index
    %c11 = arith.constant 11 : index
    %279 = memref.load %arg6[%c0_127, %c11] : memref<4x12xf32, #tpu.memory_space<smem>>
    %280 = vector.broadcast %279 : f32 to vector<4x128xf32>
    %281 = arith.mulf %280, %270 : vector<4x128xf32>
    %282 = arith.addf %278, %281 : vector<4x128xf32>
    %c1_128 = arith.constant 1 : index
    %c9_129 = arith.constant 9 : index
    %283 = memref.load %arg6[%c1_128, %c9_129] : memref<4x12xf32, #tpu.memory_space<smem>>
    %284 = vector.broadcast %283 : f32 to vector<4x128xf32>
    %285 = arith.mulf %284, %267 : vector<4x128xf32>
    %286 = arith.addf %240, %285 : vector<4x128xf32>
    %c1_130 = arith.constant 1 : index
    %c10_131 = arith.constant 10 : index
    %287 = memref.load %arg6[%c1_130, %c10_131] : memref<4x12xf32, #tpu.memory_space<smem>>
    %288 = vector.broadcast %287 : f32 to vector<4x128xf32>
    %289 = arith.mulf %288, %78 : vector<4x128xf32>
    %290 = arith.addf %286, %289 : vector<4x128xf32>
    %c1_132 = arith.constant 1 : index
    %c11_133 = arith.constant 11 : index
    %291 = memref.load %arg6[%c1_132, %c11_133] : memref<4x12xf32, #tpu.memory_space<smem>>
    %292 = vector.broadcast %291 : f32 to vector<4x128xf32>
    %293 = arith.mulf %292, %270 : vector<4x128xf32>
    %294 = arith.addf %290, %293 : vector<4x128xf32>
    %c2_134 = arith.constant 2 : index
    %c9_135 = arith.constant 9 : index
    %295 = memref.load %arg6[%c2_134, %c9_135] : memref<4x12xf32, #tpu.memory_space<smem>>
    %296 = vector.broadcast %295 : f32 to vector<4x128xf32>
    %297 = arith.mulf %296, %267 : vector<4x128xf32>
    %298 = arith.addf %252, %297 : vector<4x128xf32>
    %c2_136 = arith.constant 2 : index
    %c10_137 = arith.constant 10 : index
    %299 = memref.load %arg6[%c2_136, %c10_137] : memref<4x12xf32, #tpu.memory_space<smem>>
    %300 = vector.broadcast %299 : f32 to vector<4x128xf32>
    %301 = arith.mulf %300, %78 : vector<4x128xf32>
    %302 = arith.addf %298, %301 : vector<4x128xf32>
    %c2_138 = arith.constant 2 : index
    %c11_139 = arith.constant 11 : index
    %303 = memref.load %arg6[%c2_138, %c11_139] : memref<4x12xf32, #tpu.memory_space<smem>>
    %304 = vector.broadcast %303 : f32 to vector<4x128xf32>
    %305 = arith.mulf %304, %270 : vector<4x128xf32>
    %306 = arith.addf %302, %305 : vector<4x128xf32>
    %c3_140 = arith.constant 3 : index
    %c9_141 = arith.constant 9 : index
    %307 = memref.load %arg6[%c3_140, %c9_141] : memref<4x12xf32, #tpu.memory_space<smem>>
    %308 = vector.broadcast %307 : f32 to vector<4x128xf32>
    %309 = arith.mulf %308, %267 : vector<4x128xf32>
    %310 = arith.addf %264, %309 : vector<4x128xf32>
    %c3_142 = arith.constant 3 : index
    %c10_143 = arith.constant 10 : index
    %311 = memref.load %arg6[%c3_142, %c10_143] : memref<4x12xf32, #tpu.memory_space<smem>>
    %312 = vector.broadcast %311 : f32 to vector<4x128xf32>
    %313 = arith.mulf %312, %78 : vector<4x128xf32>
    %314 = arith.addf %310, %313 : vector<4x128xf32>
    %c3_144 = arith.constant 3 : index
    %c11_145 = arith.constant 11 : index
    %315 = memref.load %arg6[%c3_144, %c11_145] : memref<4x12xf32, #tpu.memory_space<smem>>
    %316 = vector.broadcast %315 : f32 to vector<4x128xf32>
    %317 = arith.mulf %316, %270 : vector<4x128xf32>
    %318 = arith.addf %314, %317 : vector<4x128xf32>
    %cst_146 = arith.constant 0.000000e+00 : f32
    %319 = vector.broadcast %cst_146 : f32 to vector<4x128xf32>
    %320 = arith.maximumf %282, %319 : vector<4x128xf32>
    %c0_147 = arith.constant 0 : index
    %c0_148 = arith.constant 0 : index
    %c0_149 = arith.constant 0 : index
    %c0_150 = arith.constant 0 : index
    %321 = vector.load %arg9[%c0_147, %c0_148, %c0_149, %c0_150] : memref<1x4x4x128xf32, #tpu.memory_space<vmem>>, vector<1x1x4x128xf32>
    %322 = vector.shape_cast %321 : vector<1x1x4x128xf32> to vector<4x128xf32>
    %323 = vector.shape_cast %320 : vector<4x128xf32> to vector<1x1x4x128xf32>
    tpu.vector_store %arg9[%c0_147, %c0_148, %c0_149, %c0_150], %323 {strides = array<i32>} : memref<1x4x4x128xf32, #tpu.memory_space<vmem>>, vector<1x1x4x128xf32>,
    %cst_151 = arith.constant 0.000000e+00 : f32
    %324 = vector.broadcast %cst_151 : f32 to vector<4x128xf32>
    %325 = arith.maximumf %294, %324 : vector<4x128xf32>
    %c0_152 = arith.constant 0 : index
    %c1_153 = arith.constant 1 : index
    %c0_154 = arith.constant 0 : index
    %c0_155 = arith.constant 0 : index
    %326 = vector.load %arg9[%c0_152, %c1_153, %c0_154, %c0_155] : memref<1x4x4x128xf32, #tpu.memory_space<vmem>>, vector<1x1x4x128xf32>
    %327 = vector.shape_cast %326 : vector<1x1x4x128xf32> to vector<4x128xf32>
    %328 = vector.shape_cast %325 : vector<4x128xf32> to vector<1x1x4x128xf32>
    tpu.vector_store %arg9[%c0_152, %c1_153, %c0_154, %c0_155], %328 {strides = array<i32>} : memref<1x4x4x128xf32, #tpu.memory_space<vmem>>, vector<1x1x4x128xf32>,
    %cst_156 = arith.constant 0.000000e+00 : f32
    %329 = vector.broadcast %cst_156 : f32 to vector<4x128xf32>
    %330 = arith.maximumf %306, %329 : vector<4x128xf32>
    %c0_157 = arith.constant 0 : index
    %c2_158 = arith.constant 2 : index
    %c0_159 = arith.constant 0 : index
    %c0_160 = arith.constant 0 : index
    %331 = vector.load %arg9[%c0_157, %c2_158, %c0_159, %c0_160] : memref<1x4x4x128xf32, #tpu.memory_space<vmem>>, vector<1x1x4x128xf32>
    %332 = vector.shape_cast %331 : vector<1x1x4x128xf32> to vector<4x128xf32>
    %333 = vector.shape_cast %330 : vector<4x128xf32> to vector<1x1x4x128xf32>
    tpu.vector_store %arg9[%c0_157, %c2_158, %c0_159, %c0_160], %333 {strides = array<i32>} : memref<1x4x4x128xf32, #tpu.memory_space<vmem>>, vector<1x1x4x128xf32>,
    %cst_161 = arith.constant 0.000000e+00 : f32
    %334 = vector.broadcast %cst_161 : f32 to vector<4x128xf32>
    %335 = arith.maximumf %318, %334 : vector<4x128xf32>
    %c0_162 = arith.constant 0 : index
    %c3_163 = arith.constant 3 : index
    %c0_164 = arith.constant 0 : index
    %c0_165 = arith.constant 0 : index
    %336 = vector.load %arg9[%c0_162, %c3_163, %c0_164, %c0_165] : memref<1x4x4x128xf32, #tpu.memory_space<vmem>>, vector<1x1x4x128xf32>
    %337 = vector.shape_cast %336 : vector<1x1x4x128xf32> to vector<4x128xf32>
    %338 = vector.shape_cast %335 : vector<4x128xf32> to vector<1x1x4x128xf32>
    tpu.vector_store %arg9[%c0_162, %c3_163, %c0_164, %c0_165], %338 {strides = array<i32>} : memref<1x4x4x128xf32, #tpu.memory_space<vmem>>, vector<1x1x4x128xf32>,
    return
  }
  func.func @transform_0(%arg0: i32, %arg1: i32) -> (i32, i32, i32) {
    %c0_i32 = arith.constant 0 : i32
    %c0_i32_0 = arith.constant 0 : i32
    return %arg0, %arg1, %c0_i32 : i32, i32, i32
  }
  func.func @transform_1(%arg0: i32, %arg1: i32) -> (i32, i32) {
    %c0_i32 = arith.constant 0 : i32
    %c0_i32_0 = arith.constant 0 : i32
    %c0_i32_1 = arith.constant 0 : i32
    return %c0_i32, %c0_i32_0 : i32, i32
  }
  func.func @transform_2(%arg0: i32, %arg1: i32) -> (i32, i32) {
    %c0_i32 = arith.constant 0 : i32
    %c0_i32_0 = arith.constant 0 : i32
    %c0_i32_1 = arith.constant 0 : i32
    return %c0_i32, %c0_i32_0 : i32, i32
  }
  func.func @transform_3(%arg0: i32, %arg1: i32) -> i32 {
    %c0_i32 = arith.constant 0 : i32
    %c0_i32_0 = arith.constant 0 : i32
    return %c0_i32 : i32
  }
  func.func @transform_4(%arg0: i32, %arg1: i32) -> (i32, i32) {
    %c0_i32 = arith.constant 0 : i32
    %c0_i32_0 = arith.constant 0 : i32
    %c0_i32_1 = arith.constant 0 : i32
    return %c0_i32, %c0_i32_0 : i32, i32
  }
  func.func @transform_5(%arg0: i32, %arg1: i32) -> i32 {
    %c0_i32 = arith.constant 0 : i32
    %c0_i32_0 = arith.constant 0 : i32
    return %c0_i32 : i32
  }
  func.func @transform_6(%arg0: i32, %arg1: i32) -> i32 {
    %c0_i32 = arith.constant 0 : i32
    %c0_i32_0 = arith.constant 0 : i32
    return %c0_i32 : i32
  }
  func.func @transform_7(%arg0: i32, %arg1: i32) -> (i32, i32, i32, i32) {
    %c0_i32 = arith.constant 0 : i32
    %c0_i32_0 = arith.constant 0 : i32
    %c0_i32_1 = arith.constant 0 : i32
    return %arg0, %c0_i32, %arg1, %c0_i32_0 : i32, i32, i32, i32
  }
}

</mosaic_0001>

<bundles_post_ra>
// kernel: tpu_custom_call.1
= control target key start
LH: loop header
LB: loop body
LE: loop exit
PB: predicated region body
PF: predicated region fallthrough
CT: control target
= control target key end

     0   :  { %s1036_s0 = inlined_call_operand.hbm [shape: f32[1,4,128], index: 0, kind: input, shape index: {}]   ;;  %s1037_s1 = inlined_call_operand.vmem [shape: s32[1,128], index: 1, kind: input, shape index: {}]   ;;  %s1038_s2 = inlined_call_operand.hbm [shape: f32[4,3], index: 2, kind: input, shape index: {}]   ;;  %s1039_s3 = inlined_call_operand.vmem [shape: f32[4], index: 3, kind: input, shape index: {}]   ;;  %s1040_s4 = inlined_call_operand.vmem [shape: f32[4,12], index: 4, kind: input, shape index: {}]   ;;  %s1041_s5 = inlined_call_operand.vmem [shape: f32[4], index: 5, kind: input, shape index: {}]   ;;  %s1042_s6 = inlined_call_operand.vmem [shape: f32[4], index: 6, kind: input, shape index: {}]   ;;  %s1043_s7 = inlined_call_operand.hbm [shape: f32[1,4,4,128], index: 7, kind: output, shape index: {}]  }
   0x1   :  { %1049 = sst [smem:[#allocation30_spill]] %s1043_s7 }
   0x2   :  { %12 = vsyncpa [#allocation3], 0 }
   0x3   :  { %13 = vsyncpa [#allocation5], 0 }
   0x4   :  { %14 = vsyncpa [#allocation6], 0 }
   0x5   :  { %15 = vsyncpa [#allocation10], 0 }
   0x6   :  { %16 = vsyncpa [#allocation13], 0  ;;  %s54_s26 = sshll.u32 %s1040_s4, 4  ;;  %s55_s26 = int_to_ptr.vmem [resolvable:$true] %s54_s26 }
   0x7   :  { %17 = vsyncpa [#allocation4], 0  ;;  %s522_s27 = scalar_lea.vmem %s55_s26, 64  ;;  %p527_p1 = scmp.lt.s32.totalorder %s55_s26, %s55_s26 }
   0x8   :  { %p523_p0 = scmp.ne.s32.totalorder %s55_s26, %s522_s27  ;;  %p528_p2 = scmp.lt.s32.totalorder %s522_s27, %s522_s27 }
   0xa   :  { %p529_p3 = por %p528_p2, %p527_p1 }
   0xc   :  { %p530_p4 = pnand %p529_p3, %p523_p0 }
   0xe   :  { %533 = shalt.err (!%p530_p4)
}
   0xf   :  { %s630_s28 = smov [#allocation9]   ;;  %s631_s29 = smov [#allocation2]  }
  0x10   :  { %57 = dma.vmem_to_smem %s55_s26, 64, %s630_s28, [#allocation10]  }
  0x11   :  { %s24_s30 = sshll.u32 %s631_s29, 4  ;;  %s44_s10 = sshll.u32 %s1039_s3, 4  ;;  %s25_s30 = int_to_ptr.vmem [resolvable:$true] %s24_s30  ;;  %s45_s10 = int_to_ptr.vmem [resolvable:$true] %s44_s10 }
  0x12   :  { %s542_s11 = scalar_lea.vmem %s25_s30, 64  ;;  %p547_p6 = scmp.lt.s32.totalorder %s25_s30, %s25_s30 }
  0x13   :  { %p543_p5 = scmp.ne.s32.totalorder %s25_s30, %s542_s11  ;;  %p548_p7 = scmp.lt.s32.totalorder %s542_s11, %s542_s11 }
  0x15   :  { %p549_p8 = por %p548_p7, %p547_p6 }
  0x17   :  { %p550_p9 = pnand %p549_p8, %p543_p5 }
  0x19   :  { %553 = shalt.err (!%p550_p9)
}
  0x1a   :  { %27 = dma.hbm_to_vmem [thread:$0]  %s1036_s0, 64, %s25_s30, [#allocation3]  }
  0x1b   :  { %s632_s13 = smov [#allocation7]   ;;  %s562_s16 = scalar_lea.vmem %s45_s10, 16 }
  0x1c   :  { %37 = dma.hbm_to_smem %s1038_s2, 64, %s632_s13, [#allocation5]  }
  0x1d   :  { %p563_p10 = scmp.ne.s32.totalorder %s45_s10, %s562_s16  ;;  %p567_p11 = scmp.lt.s32.totalorder %s45_s10, %s45_s10 }
  0x1e   :  { %p568_p12 = scmp.lt.s32.totalorder %s562_s16, %s562_s16 }
  0x20   :  { %p569_p13 = por %p568_p12, %p567_p11 }
  0x22   :  { %p570_p0 = pnand %p569_p13, %p563_p10 }
  0x24   :  { %573 = shalt.err (!%p570_p0)
}
  0x25   :  { %s633_s3 = smov [#allocation8]   ;;  %s64_s19 = sshll.u32 %s1041_s5, 4  ;;  %s65_s19 = int_to_ptr.vmem [resolvable:$true] %s64_s19 }
  0x26   :  { %47 = dma.vmem_to_smem %s45_s10, 16, %s633_s3, [#allocation6]  }
  0x27   :  { %s74_s21 = sshll.u32 %s1042_s6, 4  ;;  %s574_s2 = scalar_lea.vmem %s65_s19, 16  ;;  %s75_s21 = int_to_ptr.vmem [resolvable:$true] %s74_s21 }
  0x28   :  { %p575_p1 = scmp.ne.s32.totalorder %s65_s19, %s574_s2  ;;  %p579_p2 = scmp.lt.s32.totalorder %s65_s19, %s65_s19 }
  0x29   :  { %p580_p3 = scmp.lt.s32.totalorder %s574_s2, %s574_s2 }
  0x2b   :  { %p581_p4 = por %p580_p3, %p579_p2 }
  0x2d   :  { %p582_p5 = pnand %p581_p4, %p575_p1 }
  0x2f   :  { %585 = shalt.err (!%p582_p5)
}
  0x30   :  { %s634_s22 = smov [#allocation11]   ;;  %s586_s23 = scalar_lea.vmem %s75_s21, 16 }
  0x31   :  { %67 = dma.vmem_to_smem %s65_s19, 16, %s634_s22, [#allocation10]  }
  0x32   :  { %p587_p6 = scmp.ne.s32.totalorder %s75_s21, %s586_s23  ;;  %p591_p7 = scmp.lt.s32.totalorder %s75_s21, %s75_s21 }
  0x33   :  { %p592_p8 = scmp.lt.s32.totalorder %s586_s23, %s586_s23 }
  0x35   :  { %p593_p9 = por %p592_p8, %p591_p7 }
  0x37   :  { %p594_p10 = pnand %p593_p9, %p587_p6 }
  0x39   :  { %597 = shalt.err (!%p594_p10)
}
  0x3a   :  { %s635_s5 = smov [#allocation12]  }
  0x3b   :  { %77 = dma.vmem_to_smem %s75_s21, 16, %s635_s5, [#allocation13]  }
  0x3c   :  { %618 = dma.done.wait [#allocation3], 64  }
  0x3d   :  { %619 = vsyncadd [#allocation3], 4294967232 }
  0x3e   :  { %620 = dma.done.wait [#allocation5], 64  }
  0x3f   :  { %621 = vsyncadd [#allocation5], 4294967232 }
  0x40   :  { %622 = dma.done.wait [#allocation6], 16  }
  0x41   :  { %623 = vsyncadd [#allocation6], 4294967280 }
  0x42   :  { %624 = dma.done.wait [#allocation10], 80  }
  0x43   :  { %625 = vsyncadd [#allocation10], 4294967216 }
  0x44   :  { %626 = dma.done.wait [#allocation13], 16  }
  0x45   :  { %627 = vsyncadd [#allocation13], 4294967280 }
  0x46   :  { %96 = sfence }
  0x47   :  { %v699_v0 = vld [vmem:[#allocation2] sm:$0xf]  ;;  %s636_s6 = smov 1   ;;  %s637_s24 = smov 127  }
  0x48   :  { %105 = vrot.lane.b32.xlu0 %v699_v0, %s636_s6  ;;  %s111_s25 = sld [smem:[#allocation7]]  ;;  %v716_v1 = vld [vmem:[%s1037_s1] ss:$0 sm:$0xff] }
  0x49   :  { %s444_s26 = sld [smem:[#allocation7 + $0x1]]  ;;  %vm103_vm0 = vcmp.ne.s32.totalorder %v716_v1, 0  ;;  %vm104_vm1 = vcmp.ne.s32.totalorder %v716_v1, 15 }
  0x4a   :  { %s446_s27 = sld [smem:[#allocation7 + $0x80]] }
  0x4b   :  { %s447_s28 = sld [smem:[#allocation7 + $0x81]] }
  0x4c   :  { %108 = vrot.lane.b32.xlu0 %v699_v0, %s637_s24  ;;  %s450_s29 = sld [smem:[#allocation7 + $0x100]] }
  0x4d   :  { %s451_s30 = sld [smem:[#allocation7 + $0x101]] }
  0x4e   :  { %s705_s8 = sld [smem:[#allocation7 + $0x180]]  ;;  %v112_v4 = vstv %s111_s25 }
  0x4f   :  { %s707_s9 = sld [smem:[#allocation7 + $0x181]]  ;;  %v115_v2 = vstv %s444_s26 }
  0x50   :  { %s709_s10 = sld [smem:[#allocation7 + $0x2]]  ;;  %v127_v5 = vstv %s446_s27  ;;  %v116_v9 = vmul.f32 %v115_v2, %v699_v0 }
  0x51   :  { %s711_s11 = sld [smem:[#allocation7 + $0x82]]  ;;  %v130_v3 = vstv %s447_s28 }
  0x52   :  { %s718_s13 = sld [smem:[#allocation7 + $0x102]]  ;;  %v142_v6 = vstv %s450_s29  ;;  %v131_v13 = vmul.f32 %v130_v3, %v699_v0 }
  0x53   :  { %s720_s14 = sld [smem:[#allocation7 + $0x182]]  ;;  %v145_v7 = vstv %s451_s30 }
  0x54   :  { %s723_s15 = sld [smem:[#allocation8]]  ;;  %v157_v10 = vstv %s705_s8  ;;  %v146_v17 = vmul.f32 %v145_v7, %v699_v0 }
  0x55   :  { %s725_s1 = sld [smem:[#allocation8 + $0x1]]  ;;  %v160_v11 = vstv %s707_s9 }
  0x56   :  { %s734_s16 = sld [smem:[#allocation8 + $0x2]]  ;;  %v119_v18 = vstv %s709_s10  ;;  %v161_v21 = vmul.f32 %v160_v11, %v699_v0 }
  0x57   :  { %v134_v19 = vstv %s711_s11  ;;  %s457_s3 = sld [smem:[#allocation8 + $0x3]] }
  0x58   :  { %v149_v20 = vstv %s718_s13  ;;  %s771_s17 = sld [smem:[#allocation9 + $0x3]] }
  0x59   :  { %v164_v22 = vstv %s720_s14  ;;  %s773_s18 = sld [smem:[#allocation9 + $0x83]] }
  0x5a   :  { %v123_v32 = vstv %s723_s15  ;;  %s775_s19 = sld [smem:[#allocation9 + $0x103]] }
  0x5b   :  { %v138_v33 = vstv %s725_s1  ;;  %s777_s0 = sld [smem:[#allocation9 + $0x183]] }
  0x5c   :  { %v153_v38 = vstv %s734_s16  ;;  %s779_s20 = sld [smem:[#allocation9 + $0x1]] }
  0x5d   :  { %v168_v46 = vstv %s457_s3  ;;  %s781_s21 = sld [smem:[#allocation9 + $0x81]] }
  0x5e   :  { %s783_s2 = sld [smem:[#allocation9 + $0x101]]  ;;  %v256_v50 = vstv %s771_s17 }
  0x5f   :  { %1050 = sst [smem:[#allocation21_spill]] %s773_s18  ;;  %v268_v51 = vstv %s773_s18 }
  0x60   :  { %s785_s22 = sld [smem:[#allocation9 + $0x181]]  ;;  %v280_v52 = vstv %s775_s19 }
  0x61   :  { %1051 = sst [smem:[#allocation22_spill]] %s777_s0  ;;  %v292_v53 = vstv %s777_s0 }
  0x62   :  { %s787_s23 = sld [smem:[#allocation9 + $0x4]]  ;;  %v206_v57 = vstv %s779_s20 }
  0x63   :  { %s789_s5 = sld [smem:[#allocation9 + $0x84]]  ;;  %v218_v59 = vstv %s781_s21 }
  0x64   :  { %s795_s25 = sld [smem:[#allocation9 + $0x7]]  ;;  %v230_v60 = vstv %s783_s2 }
  0x65   :  { %s797_s26 = sld [smem:[#allocation9 + $0x87]] }
  0x66   :  { %s799_s27 = sld [smem:[#allocation9 + $0x107]]  ;;  %v242_v61 = vstv %s785_s22 }
  0x67   :  { %s801_s28 = sld [smem:[#allocation9 + $0x187]] }
  0x68   :  { %s803_s29 = sld [smem:[#allocation9 + $0xa]]  ;;  %v260_v62 = vstv %s787_s23 }
  0x69   :  { %s805_s30 = sld [smem:[#allocation9 + $0x8a]]  ;;  %v272_v63 = vstv %s789_s5 }
  0x6a   :  { %s807_s8 = sld [smem:[#allocation9 + $0x10a]]  ;;  %v314_v7 = vstv %s795_s25 }
  0x6b   :  { %s809_s9 = sld [smem:[#allocation9 + $0x18a]] }
  0x6c   :  { %s811_s10 = sld [smem:[#allocation11]] }
  0x6d   :  { %1052 = sst [smem:[#allocation23_spill]] %s801_s28 }
  0x6e   :  { %1053 = sst [smem:[#allocation24_spill]] %s803_s29 }
  0x6f   :  { %1054 = sst [smem:[#allocation25_spill]] %s805_s30 }
  0x70   :  { %1055 = sst [smem:[#allocation26_spill]] %s807_s8 }
  0x71   :  { %1056 = sst [smem:[#allocation27_spill]] %s809_s9 }
  0x72   :  { %s813_s11 = sld [smem:[#allocation11 + $0x1]]  ;;  %v172_v54 = vstv %s811_s10 }
  0x73   :  { %s815_s4 = sld [smem:[#allocation12]] }
  0x74   :  { %s817_s12 = sld [smem:[#allocation12 + $0x1]] }
  0x75   :  { %s819_s13 = sld [smem:[#allocation11 + $0x2]] }
  0x76   :  { %s821_s14 = sld [smem:[#allocation12 + $0x2]] }
  0x77   :  { %s823_s15 = sld [smem:[#allocation11 + $0x3]] }
  0x78   :  { %s825_s1 = sld [smem:[#allocation12 + $0x3]]  ;;  %v178_v55 = vstv %s813_s11 }
  0x79   :  { %s827_s16 = sld [smem:[#allocation9]] }
  0x7a   :  { %s829_s3 = sld [smem:[#allocation9 + $0x80]] }
  0x7b   :  { %s831_s7 = sld [smem:[#allocation9 + $0x100]]  ;;  %v184_v56 = vstv %s819_s13 }
  0x7c   :  { %s833_s9 = sld [smem:[#allocation9 + $0x180]] }
  0x7d   :  { %s835_s8 = sld [smem:[#allocation9 + $0x6]]  ;;  %v190_v58 = vstv %s823_s15 }
  0x7e   :  { %s837_s30 = sld [smem:[#allocation9 + $0x86]]  ;;  %v191_v11 = vmul.f32 %v190_v58, %v699_v0 }
  0x7f   :  { %s839_s29 = sld [smem:[#allocation9 + $0x106]] }
  0x80   :  { %s841_s28 = sld [smem:[#allocation9 + $0x186]] }
  0x81   :  { %s858_s18 = sld [smem:[#allocation9 + $0x102]] }
  0x82   :  { %1057 = sst [smem:[#allocation28_spill]] %s833_s9 }
  0x83   :  { %s847_s9 = sld [smem:[#allocation9 + $0x2]] }
  0x84   :  { %1058 = sst [smem:[#allocation29_spill]] %s837_s30 }
  0x85   :  { %s853_s30 = sld [smem:[#allocation9 + $0x82]] }
  0x86   :  { %s861_s0 = sld [smem:[#allocation9 + $0x182]] }
  0x87   :  { %s1059_s20 = sld [smem:[#allocation23_spill]] }
  0x88   :  { %s1060_s10 = sld [smem:[#allocation24_spill]] }
  0x89   :  { %s1061_s21 = sld [smem:[#allocation25_spill]] }
  0x8a   :  { %s1062_s2 = sld [smem:[#allocation26_spill]] }
  0x8b   :  { %s870_s22 = sld [smem:[#allocation9 + $0x9]] }
  0x8c   :  { %s1063_s11 = sld [smem:[#allocation27_spill]] }
  0x8d   :  { %s877_s23 = sld [smem:[#allocation9 + $0x89]] }
  0x8e   :  { %s880_s5 = sld [smem:[#allocation9 + $0x109]] }
  0x8f   :  { %s1065_s25 = sld [smem:[#allocation29_spill]] }
  0x90   :  { %s970_s17 = sld [smem:[#allocation9 + $0x188]] }
  0x91   :  { %s976_s13 = sld [smem:[#allocation9 + $0xb]] }
  0x92   :  { %s994_s19 = sld [smem:[#allocation9 + $0x10b]] }
  0xba   :  { %v106_v8 = vpop.permute.xlu0 %105 }
  0xbb   :  { %v107_v12 = vsel %vm103_vm0, %v106_v8, 0.0  ;;  %v175_v8 = vstv %s815_s4  ;;  %s892_s4 = sld [smem:[#allocation9 + $0x5]] }
  0xbc   :  { %v113_v14 = vmul.f32 %v112_v4, %v107_v12  ;;  %v128_v15 = vmul.f32 %v127_v5, %v107_v12  ;;  %v143_v16 = vmul.f32 %v142_v6, %v107_v12  ;;  %v158_v26 = vmul.f32 %v157_v10, %v107_v12 }
  0xbd   :  { %v173_v4 = vmul.f32 %v172_v54, %v699_v0  ;;  %v179_v5 = vmul.f32 %v178_v55, %v699_v0  ;;  %v185_v6 = vmul.f32 %v184_v56, %v699_v0  ;;  %v187_v10 = vstv %s821_s14  ;;  %s982_s14 = sld [smem:[#allocation9 + $0x8b]] }
  0xbe   :  { %v109_v23 = vpop.permute.xlu0 %108  ;;  %v117_v24 = vadd.f32 %v116_v9, %v113_v14  ;;  %v132_v25 = vadd.f32 %v131_v13, %v128_v15  ;;  %v147_v28 = vadd.f32 %v146_v17, %v143_v16  ;;  %v162_v39 = vadd.f32 %v161_v21, %v158_v26 }
  0xbf   :  { %v110_v27 = vsel %vm104_vm1, %v109_v23, 0.0  ;;  %v181_v9 = vstv %s817_s12  ;;  %v193_v12 = vstv %s825_s1  ;;  %v326_v13 = vstv %s797_s26  ;;  %s897_s26 = sld [smem:[#allocation9 + $0x85]] }
  0xc0   :  { %v120_v29 = vmul.f32 %v119_v18, %v110_v27  ;;  %v135_v30 = vmul.f32 %v134_v19, %v110_v27  ;;  %v150_v31 = vmul.f32 %v149_v20, %v110_v27  ;;  %v165_v37 = vmul.f32 %v164_v22, %v110_v27  ;;  %s909_s12 = sld [smem:[#allocation9 + $0x185]] }
  0xc1   :  { %v338_v14 = vstv %s799_s27  ;;  %v350_v15 = vstv %s1059_s20  ;;  %v368_v16 = vstv %s1060_s10  ;;  %v380_v17 = vstv %s1061_s21  ;;  %s903_s27 = sld [smem:[#allocation9 + $0x105]] }
  0xc2   :  { %v121_v34 = vadd.f32 %v120_v29, %v117_v24  ;;  %v136_v35 = vadd.f32 %v135_v30, %v132_v25  ;;  %v151_v36 = vadd.f32 %v150_v31, %v147_v28  ;;  %v166_v45 = vadd.f32 %v165_v37, %v162_v39 }
  0xc3   :  { %v392_v0 = vstv %s1062_s2  ;;  %v404_v18 = vstv %s1063_s11  ;;  %v176_v19 = vadd.f32 %v175_v8, %v173_v4  ;;  %v182_v20 = vadd.f32 %v181_v9, %v179_v5 }
  0xc4   :  { %v124_v40 = vadd.f32 %v123_v32, %v121_v34  ;;  %v139_v41 = vadd.f32 %v138_v33, %v136_v35  ;;  %v154_v44 = vadd.f32 %v153_v38, %v151_v36  ;;  %v169_v48 = vadd.f32 %v168_v46, %v166_v45 }
  0xc5   :  { %v188_v21 = vadd.f32 %v187_v10, %v185_v6  ;;  %v202_v22 = vstv %s827_s16  ;;  %v194_v23 = vadd.f32 %v193_v12, %v191_v11  ;;  %v214_v24 = vstv %s829_s3 }
  0xc6   :  { %v747_v42 = vmax.f32 %v124_v40, 0.0  ;;  %v749_v43 = vmax.f32 %v139_v41, 0.0  ;;  %v755_v47 = vmax.f32 %v154_v44, 0.0  ;;  %v761_v49 = vmax.f32 %v169_v48, 0.0 }
  0xc7   :  { %v226_v25 = vstv %s831_s7  ;;  %v310_v27 = vstv %s835_s8  ;;  %v322_v28 = vstv %s1065_s25  ;;  %v334_v29 = vstv %s839_s29  ;;  %s919_s7 = sld [smem:[#allocation9 + $0x8]] }
  0xc8   :  { %249 = vrot.lane.b32.xlu0 %v749_v43, %s636_s6  ;;  %195 = vrot.lane.b32.xlu1 %v747_v42, %s636_s6  ;;  %v346_v30 = vstv %s841_s28  ;;  %v210_v31 = vstv %s847_s9  ;;  %v207_v32 = vmul.f32 %v206_v57, %v747_v42  ;;  %v219_v33 = vmul.f32 %v218_v59, %v747_v42  ;;  %s1000_s8 = sld [smem:[#allocation9 + $0x18b]]  ;;  %s638_s28 = smov [#allocation14]  }
  0xc9   :  { %v231_v34 = vmul.f32 %v230_v60, %v747_v42  ;;  %v222_v35 = vstv %s853_s30  ;;  %v243_v36 = vmul.f32 %v242_v61, %v747_v42  ;;  %v914_v37 = vmul.f32 %v260_v62, %v749_v43  ;;  %s957_s30 = sld [smem:[#allocation9 + $0x108]]  ;;  %s427_s29 = sshll.u32 %s638_s28, 4  ;;  %s428_s29 = int_to_ptr.vmem [resolvable:$true] %s427_s29 }
  0xca   :  { %v917_v38 = vmul.f32 %v272_v63, %v749_v43  ;;  %v234_v40 = vstv %s858_s18  ;;  %v929_v45 = vmul.f32 %v314_v7, %v755_v47  ;;  %v934_v48 = vmul.f32 %v326_v13, %v755_v47  ;;  %s950_s18 = sld [smem:[#allocation9 + $0x88]]  ;;  %s598_s15 = scalar_lea.vmem %s428_s29, 256 }
  0xcb   :  { %v937_v54 = vmul.f32 %v338_v14, %v755_v47  ;;  %v940_v55 = vmul.f32 %v350_v15, %v755_v47  ;;  %v364_v56 = vstv %s870_s22  ;;  %v945_v57 = vmul.f32 %v368_v16, %v761_v49  ;;  %p599_p11 = scmp.ne.s32.totalorder %s428_s29, %s598_s15  ;;  %p603_p12 = scmp.lt.s32.totalorder %s428_s29, %s428_s29 }
  0xcc   :  { %303 = vrot.lane.b32.xlu0 %v755_v47, %s636_s6  ;;  %198 = vrot.lane.b32.xlu1 %v747_v42, %s637_s24  ;;  %v948_v58 = vmul.f32 %v380_v17, %v761_v49  ;;  %v264_v10 = vstv %s892_s4  ;;  %v276_v11 = vstv %s897_s26  ;;  %p604_p13 = scmp.lt.s32.totalorder %s598_s15, %s598_s15 }
  0xcd   :  { %v288_v12 = vstv %s903_s27  ;;  %v300_v16 = vstv %s909_s12  ;;  %v318_v17 = vstv %s919_s7 }
  0xce   :  { %p605_p0 = por %p604_p13, %p603_p12 }
  0xd0   :  { %357 = vrot.lane.b32.xlu0 %v761_v49, %s636_s6  ;;  %252 = vrot.lane.b32.xlu1 %v749_v43, %s637_s24  ;;  %s791_s6 = sld [smem:[#allocation9 + $0x104]]  ;;  %p606_p1 = pnand %p605_p0, %p599_p11 }
  0xd4   :  { %306 = vrot.lane.b32.xlu1 %v755_v47, %s637_s24 }
  0xd6   :  { %v284_v2 = vstv %s791_s6  ;;  %s1064_s6 = sld [smem:[#allocation28_spill]] }
  0xd7   :  { %v923_v41 = vmul.f32 %v284_v2, %v749_v43  ;;  %v376_v2 = vstv %s877_s23 }
  0xd8   :  { %360 = vrot.lane.b32.xlu1 %v761_v49, %s637_s24  ;;  %s793_s24 = sld [smem:[#allocation9 + $0x184]] }
  0xdc   :  { %v238_v26 = vstv %s1064_s6 }
  0xde   :  { %v296_v3 = vstv %s793_s24  ;;  %s885_s24 = sld [smem:[#allocation9 + $0x189]] }
  0xdf   :  { %v926_v44 = vmul.f32 %v296_v3, %v749_v43  ;;  %v246_v43 = vstv %s861_s0  ;;  %v388_v3 = vstv %s880_s5 }
  0xe4   :  { %v400_v4 = vstv %s885_s24 }
 0x13a   :  { %v196_v39 = vpop.permute.xlu1 %195  ;;  %v250_v42 = vpop.permute.xlu0 %249 }
 0x13b   :  { %v197_v46 = vsel %vm103_vm0, %v196_v39, 0.0  ;;  %v251_v47 = vsel %vm103_vm0, %v250_v42, 0.0 }
 0x13c   :  { %v203_v59 = vmul.f32 %v202_v22, %v197_v46  ;;  %v215_v60 = vmul.f32 %v214_v24, %v197_v46  ;;  %v227_v61 = vmul.f32 %v226_v25, %v197_v46  ;;  %v239_v62 = vmul.f32 %v238_v26, %v197_v46 }
 0x13d   :  { %v257_v13 = vmul.f32 %v256_v50, %v251_v47  ;;  %v269_v14 = vmul.f32 %v268_v51, %v251_v47  ;;  %v281_v50 = vmul.f32 %v280_v52, %v251_v47  ;;  %v330_v46 = vstv %s950_s18 }
 0x13e   :  { %v199_v63 = vpop.permute.xlu1 %198  ;;  %v204_v5 = vadd.f32 %v203_v59, %v176_v19  ;;  %v216_v6 = vadd.f32 %v215_v60, %v182_v20  ;;  %v228_v7 = vadd.f32 %v227_v61, %v188_v21  ;;  %v240_v8 = vadd.f32 %v239_v62, %v194_v23  ;;  %v304_v15 = vpop.permute.xlu0 %303 }
 0x13f   :  { %v200_v9 = vsel %vm104_vm1, %v199_v63, 0.0  ;;  %v305_v51 = vsel %vm103_vm0, %v304_v15, 0.0  ;;  %v342_v52 = vstv %s957_s30  ;;  %v354_v15 = vstv %s970_s17 }
 0x140   :  { %v208_v22 = vadd.f32 %v207_v32, %v204_v5  ;;  %v211_v19 = vmul.f32 %v210_v31, %v200_v9  ;;  %v220_v20 = vadd.f32 %v219_v33, %v216_v6  ;;  %v223_v21 = vmul.f32 %v222_v35, %v200_v9 }
 0x141   :  { %v232_v24 = vadd.f32 %v231_v34, %v228_v7  ;;  %v235_v25 = vmul.f32 %v234_v40, %v200_v9  ;;  %v244_v26 = vadd.f32 %v243_v36, %v240_v8  ;;  %v247_v39 = vmul.f32 %v246_v43, %v200_v9 }
 0x142   :  { %v253_v23 = vpop.permute.xlu1 %252  ;;  %v212_v32 = vadd.f32 %v211_v19, %v208_v22  ;;  %v224_v31 = vadd.f32 %v223_v21, %v220_v20  ;;  %v293_v33 = vmul.f32 %v292_v53, %v251_v47  ;;  %v311_v43 = vmul.f32 %v310_v27, %v305_v51  ;;  %v358_v62 = vpop.permute.xlu0 %357 }
 0x143   :  { %v236_v34 = vadd.f32 %v235_v25, %v232_v24  ;;  %v248_v35 = vadd.f32 %v247_v39, %v244_v26  ;;  %v254_v36 = vsel %vm104_vm1, %v253_v23, 0.0  ;;  %v323_v59 = vmul.f32 %v322_v28, %v305_v51 }
 0x144   :  { %v258_v40 = vadd.f32 %v257_v13, %v212_v32  ;;  %v270_v42 = vadd.f32 %v269_v14, %v224_v31  ;;  %v265_v47 = vmul.f32 %v264_v10, %v254_v36  ;;  %v277_v5 = vmul.f32 %v276_v11, %v254_v36 }
 0x145   :  { %v282_v60 = vadd.f32 %v281_v50, %v236_v34  ;;  %v294_v61 = vadd.f32 %v293_v33, %v248_v35  ;;  %v289_v8 = vmul.f32 %v288_v12, %v254_v36  ;;  %v301_v28 = vmul.f32 %v300_v16, %v254_v36 }
 0x146   :  { %v262_v53 = vadd.f32 %v914_v37, %v258_v40  ;;  %v274_v63 = vadd.f32 %v917_v38, %v270_v42  ;;  %v307_v6 = vpop.permute.xlu1 %306  ;;  %v335_v9 = vmul.f32 %v334_v29, %v305_v51  ;;  %v359_v37 = vsel %vm103_vm0, %v358_v62, 0.0 }
 0x147   :  { %v286_v7 = vadd.f32 %v923_v41, %v282_v60  ;;  %v298_v27 = vadd.f32 %v926_v44, %v294_v61  ;;  %v347_v41 = vmul.f32 %v346_v30, %v305_v51  ;;  %v308_v44 = vsel %vm104_vm1, %v307_v6, 0.0 }
 0x148   :  { %v266_v38 = vadd.f32 %v265_v47, %v262_v53  ;;  %v278_v10 = vadd.f32 %v277_v5, %v274_v63  ;;  %v372_v29 = vstv %s976_s13  ;;  %v365_v16 = vmul.f32 %v364_v56, %v359_v37 }
 0x149   :  { %v290_v11 = vadd.f32 %v289_v8, %v286_v7  ;;  %v302_v12 = vadd.f32 %v301_v28, %v298_v27  ;;  %v384_v20 = vstv %s982_s14  ;;  %v319_v30 = vmul.f32 %v318_v17, %v308_v44 }
 0x14a   :  { %v312_v13 = vadd.f32 %v311_v43, %v266_v38  ;;  %v324_v14 = vadd.f32 %v323_v59, %v278_v10  ;;  %v331_v24 = vmul.f32 %v330_v46, %v308_v44  ;;  %v361_v25 = vpop.permute.xlu1 %360  ;;  %v343_v39 = vmul.f32 %v342_v52, %v308_v44 }
 0x14b   :  { %v336_v22 = vadd.f32 %v335_v9, %v290_v11  ;;  %v348_v19 = vadd.f32 %v347_v41, %v302_v12  ;;  %v355_v56 = vmul.f32 %v354_v15, %v308_v44  ;;  %v377_v51 = vmul.f32 %v376_v2, %v359_v37 }
 0x14c   :  { %v316_v21 = vadd.f32 %v929_v45, %v312_v13  ;;  %v328_v23 = vadd.f32 %v934_v48, %v324_v14  ;;  %v389_v32 = vmul.f32 %v388_v3, %v359_v37  ;;  %v401_v48 = vmul.f32 %v400_v4, %v359_v37 }
 0x14d   :  { %v340_v26 = vadd.f32 %v937_v54, %v336_v22  ;;  %v352_v50 = vadd.f32 %v940_v55, %v348_v19  ;;  %v362_v34 = vsel %vm104_vm1, %v361_v25, 0.0  ;;  %v396_v36 = vstv %s994_s19 }
 0x14e   :  { %v320_v45 = vadd.f32 %v319_v30, %v316_v21  ;;  %v332_v17 = vadd.f32 %v331_v24, %v328_v23  ;;  %v408_v55 = vstv %s1000_s8  ;;  %v393_v2 = vmul.f32 %v392_v0, %v761_v49 }
 0x14f   :  { %v344_v31 = vadd.f32 %v343_v39, %v340_v26  ;;  %v356_v33 = vadd.f32 %v355_v56, %v352_v50  ;;  %v405_v3 = vmul.f32 %v404_v18, %v761_v49  ;;  %v373_v4 = vmul.f32 %v372_v29, %v362_v34 }
 0x150   :  { %v366_v54 = vadd.f32 %v365_v16, %v320_v45  ;;  %v378_v35 = vadd.f32 %v377_v51, %v332_v17  ;;  %v385_v43 = vmul.f32 %v384_v20, %v362_v34  ;;  %v397_v59 = vmul.f32 %v396_v36, %v362_v34 }
 0x151   :  { %v390_v40 = vadd.f32 %v389_v32, %v344_v31  ;;  %v402_v42 = vadd.f32 %v401_v48, %v356_v33  ;;  %v409_v61 = vmul.f32 %v408_v55, %v362_v34 }
 0x152   :  { %v370_v46 = vadd.f32 %v945_v57, %v366_v54  ;;  %v382_v52 = vadd.f32 %v948_v58, %v378_v35 }
 0x153   :  { %v394_v1 = vadd.f32 %v393_v2, %v390_v40  ;;  %v406_v60 = vadd.f32 %v405_v3, %v402_v42 }
 0x154   :  { %v374_v62 = vadd.f32 %v373_v4, %v370_v46  ;;  %v386_v53 = vadd.f32 %v385_v43, %v382_v52 }
 0x155   :  { %v398_v47 = vadd.f32 %v397_v59, %v394_v1  ;;  %v410_v63 = vadd.f32 %v409_v61, %v406_v60 }
 0x156   :  { %v411_v0 = vmax.f32 %v374_v62, 0.0  ;;  %v413_v5 = vmax.f32 %v386_v53, 0.0 }
 0x157   :  { %v416_v6 = vmax.f32 %v398_v47, 0.0  ;;  %v419_v49 = vmax.f32 %v410_v63, 0.0 }
 0x158   :  { %412 = vst [vmem:[#allocation14] sm:$0xf] %v411_v0  ;;  %415 = vst [vmem:[#allocation14 + $0x4] sm:$0xf] %v413_v5 }
 0x159   :  { %418 = vst [vmem:[#allocation14 + $0x8] sm:$0xf] %v416_v6  ;;  %421 = vst [vmem:[#allocation14 + $0xc] sm:$0xf] %v419_v49 }
 0x15a   :  { %609 = shalt.err (!%p606_p1)
}
 0x15b   :  { %s639_s1 = smov 64   ;;  %s640_s16 = smov 4  }
 0x15c   :  { %s1068_s10 = sld [smem:[#allocation30_spill]] }
 0x162   :  { %433 = dma.vmem_to_hbm [thread:$0]  %s428_s29, 256, %s1068_s10, [#allocation4], %s639_s1, %s639_s1, %s640_s16  }
 0x163   :  { %628 = dma.done.wait [#allocation4], 256  }
 0x164   :  { %629 = vsyncadd [#allocation4], 4294967040 }
 0x165   :  { %437 = vsyncpa [#allocation3], 1 }
 0x166   :  { %438 = vsyncpa [#allocation4], 1 }
 0x167   :  { %439 = vsyncpa [#allocation5], 1 }
 0x168   :  { %440 = vsyncpa [#allocation6], 1 }
 0x169   :  { %441 = vsyncpa [#allocation10], 1 }
 0x16a   :  { %442 = vsyncpa [#allocation13], 1 }

</bundles_post_ra>
